<compile_context>
chip_gen: v7x
topology: tpu7x:2x2x1
jax: 0.10.0
libtpu: 0.0.40
codegen_flags: <defaults>
</compile_context>

<pallas_src>
import math
import functools

import jax
import jax.numpy as jnp
from jax import lax
from jax.experimental import pallas as pl
from jax.experimental.pallas import tpu as pltpu


def _attn_core(x_full_ref, x_q_ref, wq_ref, wkv_ref, wo3_ref, bo_ref, kv_ref,
               *, n_head, d_head, approx_recip, save_attn):
    """Per-(batch, query-block) attention math.

    x_full_ref : (1, L, D)   f32   -- full sequence (used only at q == 0 for K/V)
    x_q_ref    : (1, TQ, D)  f32   -- query block
    wq_ref     : (D, D)      cdt   -- Wq with 1/sqrt(dh) folded in, torch (out, in) layout
    wkv_ref    : (2D, D)     cdt   -- [Wk; Wv]
    wo3_ref    : (H, dh, D)  cdt   -- Wo^T row blocks grouped per head
    bo_ref     : (1, D)      f32
    kv_ref     : (2, H, dh, L) cdt scratch -- feature-major K/V, persists across q blocks
    returns    : out (TQ, D) f32, attn (H, TQ, L) f32 or None
    """
    H, dh = n_head, d_head
    D = H * dh
    cdt = kv_ref.dtype                     # MXU compute dtype (bf16 or f32)

    # ---- K/V projection: once per batch element, kept resident across query blocks. ----
    @pl.when(pl.program_id(1) == 0)
    def _():
        x_b = x_full_ref[0].astype(cdt)                                    # (L, D)
        # Fused K/V projection, feature-major: (2D, D) x (L, D)^T -> (2D, L), f32 acc.
        kv_t = lax.dot_general(wkv_ref[...], x_b,
                               dimension_numbers=(((1,), (1,)), ((), ())),
                               preferred_element_type=jnp.float32)
        # Per-head slabs written straight into the persistent scratch (8-aligned sublane
        # slices when dh % 8 == 0); runs once per batch element, so the 2H stores are noise.
        for h in range(H):
            kv_ref[0, h] = kv_t[h * dh:(h + 1) * dh, :].astype(cdt)        # K_h (dh, L)
            kv_ref[1, h] = kv_t[D + h * dh:D + (h + 1) * dh, :].astype(cdt)  # V_h (dh, L)

    # ---- Q projection for this query block (1/sqrt(dh) already folded into Wq). ----
    x_q = x_q_ref[0].astype(cdt)                                           # (TQ, D)
    q_t = lax.dot_general(wq_ref[...], x_q,
                          dimension_numbers=(((1,), (1,)), ((), ())),
                          preferred_element_type=jnp.float32)              # (D, TQ)
    # Head-major regroup of Q only (small: D x TQ); K/V stay exactly as projected.
    q_heads = jnp.stack([q_t[h * dh:(h + 1) * dh, :].T for h in range(H)],
                        axis=0)                                            # (H, TQ, dh) f32

    k_r = kv_ref[0]                                                        # (H, dh, L)
    v_r = kv_ref[1]                                                        # (H, dh, L)

    # ---- Scores: one head-batched MXU matmul, f32 accumulation. ----
    s = lax.dot_general(q_heads.astype(cdt), k_r,
                        dimension_numbers=(((2,), (1,)), ((0,), (0,))),
                        preferred_element_type=jnp.float32)                # (H, TQ, L)

    # ---- Softmax over keys; f32 throughout (v5e has no bf16 VPU/EUP path). ----
    s = s - jnp.max(s, axis=-1, keepdims=True)
    e = jnp.exp(s)
    denom = jnp.sum(e, axis=-1, keepdims=True)                             # (H, TQ, 1)

    if save_attn:
        # Exact reciprocal so the stored attention rows sum to 1.
        attn = e * pl.reciprocal(denom, approx=False)                      # (H, TQ, L) f32
        ctx = lax.dot_general(attn.astype(cdt), v_r,
                              dimension_numbers=(((2,), (2,)), ((0,), (0,))),
                              preferred_element_type=jnp.float32)          # (H, TQ, dh)
    else:
        attn = None
        # Deferred normalization: PV on unnormalized exp, rescale the small context.
        ctx = lax.dot_general(e.astype(cdt), v_r,
                              dimension_numbers=(((2,), (2,)), ((0,), (0,))),
                              preferred_element_type=jnp.float32)          # (H, TQ, dh)
        ctx = ctx * pl.reciprocal(denom, approx=approx_recip)

    # ---- Output projection: H small MXU dots accumulated into one f32 (TQ, D) tile. ----
    out = jnp.dot(ctx[0].astype(cdt), wo3_ref[0], preferred_element_type=jnp.float32)
    for h in range(1, H):
        out = out + jnp.dot(ctx[h].astype(cdt), wo3_ref[h],
                            preferred_element_type=jnp.float32)
    out = out + bo_ref[...]                                                # (TQ, D) + (1, D)
    return out, attn


def _kernel_with_attn(x_full_ref, x_q_ref, wq_ref, wkv_ref, wo3_ref, bo_ref,
                      out_ref, a_ref, kv_ref, *, n_head, d_head, approx_recip):
    out, attn = _attn_core(x_full_ref, x_q_ref, wq_ref, wkv_ref, wo3_ref, bo_ref, kv_ref,
                           n_head=n_head, d_head=d_head,
                           approx_recip=approx_recip, save_attn=True)
    out_ref[0] = out.astype(out_ref.dtype)
    a_ref[0] = attn.astype(a_ref.dtype)        # single stacked (H, TQ, L) store per step


def _kernel_no_attn(x_full_ref, x_q_ref, wq_ref, wkv_ref, wo3_ref, bo_ref,
                    out_ref, kv_ref, *, n_head, d_head, approx_recip):
    out, _ = _attn_core(x_full_ref, x_q_ref, wq_ref, wkv_ref, wo3_ref, bo_ref, kv_ref,
                        n_head=n_head, d_head=d_head,
                        approx_recip=approx_recip, save_attn=False)
    out_ref[0] = out.astype(out_ref.dtype)


def temporal_self_attention(x, wq, wk, wv, wo, bo, n_head, save_outputs=True,
                            compute_dtype=jnp.bfloat16, block_q=256,
                            attn_dtype=jnp.float32, vmem_limit_bytes=None):
    """x: (B, L, D) f32.  wq/wk/wv/wo: (D, D) in PyTorch nn.Linear (out, in) convention,
    bo: (D,).  Returns (out, A) with out (B, L, D) f32 and A (B, H, L, L) attn_dtype or None."""
    B, L, D = x.shape
    H = n_head
    assert D % H == 0, "d_model must be divisible by n_head"
    dh = D // H
    scale = 1.0 / math.sqrt(dh)
    approx_recip = jnp.dtype(compute_dtype) != jnp.dtype(jnp.float32)

    # Query-block tiling keeps per-step VMEM at O(H*TQ*L) (key for v7x 64 MiB / v6e 32 MiB).
    if block_q < L and L % block_q == 0 and block_q % 8 == 0:
        tq = block_q
    else:
        tq = L            # whole sequence per step
    nq = L // tq

    # Once-per-call weight plumbing (cheap O(D^2) XLA ops); x itself is passed untouched.
    wq_c = (wq * scale).astype(compute_dtype)                             # fold 1/sqrt(dh) into Wq
    wkv_c = jnp.concatenate([wk, wv], axis=0).astype(compute_dtype)       # (2D, D) fused K/V
    wo3_c = wo.T.reshape(H, dh, D).astype(compute_dtype)                  # (H, dh, D) per-head Wo^T
    bo2 = bo.reshape(1, D).astype(jnp.float32)                            # (1, D)

    in_specs = [
        pl.BlockSpec((1, L, D), lambda b, q: (b, 0, 0)),    # full x_b: re-DMA'd only when b changes
        pl.BlockSpec((1, tq, D), lambda b, q: (b, q, 0)),   # query block of x
        pl.BlockSpec((D, D), lambda b, q: (0, 0)),          # Wq (scaled)           -- resident
        pl.BlockSpec((2 * D, D), lambda b, q: (0, 0)),      # [Wk; Wv]              -- resident
        pl.BlockSpec((H, dh, D), lambda b, q: (0, 0, 0)),   # per-head Wo^T blocks  -- resident
        pl.BlockSpec((1, D), lambda b, q: (0, 0)),          # output bias           -- resident
    ]
    out_spec = pl.BlockSpec((1, tq, D), lambda b, q: (b, q, 0))
    scratch = [pltpu.VMEM((2, H, dh, L), compute_dtype)]    # K/V, persists across query blocks
    kw = dict(n_head=H, d_head=dh, approx_recip=approx_recip)
    cparams = pltpu.CompilerParams(
        dimension_semantics=("parallel", "arbitrary"),      # q axis carries K/V state in scratch
        vmem_limit_bytes=vmem_limit_bytes)

    if save_outputs:
        out, attn = pl.pallas_call(
            functools.partial(_kernel_with_attn, **kw),
            out_shape=(jax.ShapeDtypeStruct((B, L, D), jnp.float32),
                       jax.ShapeDtypeStruct((B, H, L, L), attn_dtype)),
            grid=(B, nq),
            in_specs=in_specs,
            out_specs=(out_spec,
                       pl.BlockSpec((1, H, tq, L), lambda b, q: (b, 0, q, 0))),
            scratch_shapes=scratch,
            compiler_params=cparams,
        )(x, x, wq_c, wkv_c, wo3_c, bo2)
        return out, attn

    out = pl.pallas_call(
        functools.partial(_kernel_no_attn, **kw),
        out_shape=jax.ShapeDtypeStruct((B, L, D), jnp.float32),
        grid=(B, nq),
        in_specs=in_specs,
        out_specs=out_spec,
        scratch_shapes=scratch,
        compiler_params=cparams,
    )(x, x, wq_c, wkv_c, wo3_c, bo2)
    return out, None


def _reference(x, wq, wk, wv, wo, bo, n_head):
    """Pure-JAX reference matching the PyTorch forward exactly."""
    B, L, D = x.shape
    H = n_head
    q = (x @ wq.T).reshape(B, L, H, -1)
    k = (x @ wk.T).reshape(B, L, H, -1)
    v = (x @ wv.T).reshape(B, L, H, -1)
    scale = 1.0 / math.sqrt(q.shape[-1])
    scores = jnp.einsum('blhd,bshd->bhls', q, k)
    A = jax.nn.softmax(scale * scores, axis=-1)
    V = jnp.einsum('bhls,bshd->blhd', A, v)
    out = V.reshape(B, L, -1)
    return out @ wo.T + bo, A


if __name__ == "__main__":
    def _check(B, L, d_model, n_head, block_q):
        key = jax.random.PRNGKey(0)
        kx, kq, kk, kv, kwo, kbo = jax.random.split(key, 6)
        bound = 1.0 / math.sqrt(d_model)
        x = jax.random.normal(kx, (B, L, d_model), dtype=jnp.float32)
        wq = jax.random.uniform(kq, (d_model, d_model), jnp.float32, -bound, bound)
        wk = jax.random.uniform(kk, (d_model, d_model), jnp.float32, -bound, bound)
        wv = jax.random.uniform(kv, (d_model, d_model), jnp.float32, -bound, bound)
        wo = jax.random.uniform(kwo, (d_model, d_model), jnp.float32, -bound, bound)
        bo = jax.random.uniform(kbo, (d_model,), jnp.float32, -bound, bound)

        out_exp, A_exp = _reference(x, wq, wk, wv, wo, bo, n_head)

        # fp32 compute path: tight check against the PyTorch-equivalent reference.
        out32, a32 = temporal_self_attention(x, wq, wk, wv, wo, bo, n_head,
                                             save_outputs=True,
                                             compute_dtype=jnp.float32, block_q=block_q)
        out32, a32 = jax.block_until_ready((out32, a32))
        assert out32.shape == (B, L, d_model) and a32.shape == (B, n_head, L, L)
        assert jnp.allclose(out32, out_exp, atol=1e-4, rtol=1e-4)
        assert jnp.allclose(a32, A_exp, atol=1e-4, rtol=1e-4)

        # bf16 MXU operands (default fast path), f32 softmax/accumulation -> loose tolerance.
        out16, a16 = temporal_self_attention(x, wq, wk, wv, wo, bo, n_head,
                                             save_outputs=True, block_q=block_q)
        out16, a16 = jax.block_until_ready((out16, a16))
        assert jnp.allclose(out16, out_exp, atol=5e-2, rtol=5e-2)
        assert jnp.allclose(a16, A_exp, atol=5e-2, rtol=5e-2)

        # save_outputs=False path: deferred softmax normalization, no A allocated/computed/DMA'd.
        outn, an = temporal_self_attention(x, wq, wk, wv, wo, bo, n_head,
                                           save_outputs=False,
                                           compute_dtype=jnp.float32, block_q=block_q)
        outn = jax.block_until_ready(outn)
        assert an is None
        assert jnp.allclose(outn, out_exp, atol=1e-4, rtol=1e-4)

    _check(2, 8, 32, 4, block_q=256)    # whole-sequence path (TQ == L)
    _check(2, 16, 32, 4, block_q=8)     # tiled query-block path (nQ == 2, exercises K/V scratch reuse)
    print("KERNEL_OK")
</pallas_src>

<mosaic_0001>
module attributes {stable_mosaic.version = 11 : i64} {
  func.func @_kernel_with_attn(%arg0: i32, %arg1: i32, %arg2: memref<1x8x32xf32, #tpu.memory_space<vmem>>, %arg3: memref<1x8x32xf32, #tpu.memory_space<vmem>>, %arg4: memref<32x32xf32, #tpu.memory_space<vmem>>, %arg5: memref<64x32xf32, #tpu.memory_space<vmem>>, %arg6: memref<4x8x32xf32, #tpu.memory_space<vmem>>, %arg7: memref<1x32xf32, #tpu.memory_space<vmem>>, %arg8: memref<1x8x32xf32, #tpu.memory_space<vmem>>, %arg9: memref<1x4x8x8xf32, #tpu.memory_space<vmem>>, %arg10: memref<2x4x8x8xf32, #tpu.memory_space<vmem>>) attributes {dimension_semantics = [#tpu.dimension_semantics<parallel>, #tpu.dimension_semantics<arbitrary>], iteration_bounds = array<i64: 2, 1>, scalar_prefetch = 0 : i64, scratch_operands = 1 : i64, tpu.core_type = #tpu.core_type<tc>, window_params = [{transform_indices = @transform_0, window_bounds = array<i64: 1, 8, 32>}, {transform_indices = @transform_1, window_bounds = array<i64: 1, 8, 32>}, {pipeline_mode = #tpu.pipeline_mode<synchronous>, transform_indices = @transform_2, window_bounds = array<i64: 32, 32>}, {pipeline_mode = #tpu.pipeline_mode<synchronous>, transform_indices = @transform_3, window_bounds = array<i64: 64, 32>}, {pipeline_mode = #tpu.pipeline_mode<synchronous>, transform_indices = @transform_4, window_bounds = array<i64: 4, 8, 32>}, {pipeline_mode = #tpu.pipeline_mode<synchronous>, transform_indices = @transform_5, window_bounds = array<i64: 1, 32>}, {transform_indices = @transform_6, window_bounds = array<i64: 1, 8, 32>}, {transform_indices = @transform_7, window_bounds = array<i64: 1, 4, 8, 8>}]} {
    %c0_i32 = arith.constant 0 : i32
    %0 = arith.cmpi eq, %arg1, %c0_i32 : i32
    %1 = arith.extui %0 : i1 to i32
    %c0_i32_0 = arith.constant 0 : i32
    %2 = arith.cmpi ne, %1, %c0_i32_0 : i32
    scf.if %2 {
      %c0_39 = arith.constant 0 : index
      %c0_40 = arith.constant 0 : index
      %c0_41 = arith.constant 0 : index
      %68 = vector.load %arg2[%c0_39, %c0_40, %c0_41] : memref<1x8x32xf32, #tpu.memory_space<vmem>>, vector<1x8x32xf32>
      %69 = vector.shape_cast %68 : vector<1x8x32xf32> to vector<8x32xf32>
      %c0_42 = arith.constant 0 : index
      %c0_43 = arith.constant 0 : index
      %70 = vector.load %arg5[%c0_42, %c0_43] : memref<64x32xf32, #tpu.memory_space<vmem>>, vector<64x32xf32>
      %cst_44 = arith.constant dense<0.000000e+00> : vector<64x8xf32>
      %71 = tpu.matmul %70, %69, %cst_44 {dimension_numbers = #tpu.dot_dimension_numbers<[1], [1], [0], [0], [0, 0, 1, 0], [], []>} : vector<64x32xf32>, vector<8x32xf32>, vector<64x8xf32> -> vector<64x8xf32>
      %72 = vector.extract_strided_slice %71 {offsets = [0, 0], sizes = [8, 8], strides = [1, 1]} : vector<64x8xf32> to vector<8x8xf32>
      %c0_45 = arith.constant 0 : index
      %c0_46 = arith.constant 0 : index
      %c0_47 = arith.constant 0 : index
      %c0_48 = arith.constant 0 : index
      %73 = vector.load %arg10[%c0_45, %c0_46, %c0_47, %c0_48] : memref<2x4x8x8xf32, #tpu.memory_space<vmem>>, vector<1x1x8x8xf32>
      %74 = vector.shape_cast %73 : vector<1x1x8x8xf32> to vector<8x8xf32>
      %75 = vector.shape_cast %72 : vector<8x8xf32> to vector<1x1x8x8xf32>
      tpu.vector_store %arg10[%c0_45, %c0_46, %c0_47, %c0_48], %75 {strides = array<i32>} : memref<2x4x8x8xf32, #tpu.memory_space<vmem>>, vector<1x1x8x8xf32>,
      %76 = vector.extract_strided_slice %71 {offsets = [32, 0], sizes = [8, 8], strides = [1, 1]} : vector<64x8xf32> to vector<8x8xf32>
      %c1_49 = arith.constant 1 : index
      %c0_50 = arith.constant 0 : index
      %c0_51 = arith.constant 0 : index
      %c0_52 = arith.constant 0 : index
      %77 = vector.load %arg10[%c1_49, %c0_50, %c0_51, %c0_52] : memref<2x4x8x8xf32, #tpu.memory_space<vmem>>, vector<1x1x8x8xf32>
      %78 = vector.shape_cast %77 : vector<1x1x8x8xf32> to vector<8x8xf32>
      %79 = vector.shape_cast %76 : vector<8x8xf32> to vector<1x1x8x8xf32>
      tpu.vector_store %arg10[%c1_49, %c0_50, %c0_51, %c0_52], %79 {strides = array<i32>} : memref<2x4x8x8xf32, #tpu.memory_space<vmem>>, vector<1x1x8x8xf32>,
      %80 = vector.extract_strided_slice %71 {offsets = [8, 0], sizes = [8, 8], strides = [1, 1]} : vector<64x8xf32> to vector<8x8xf32>
      %c0_53 = arith.constant 0 : index
      %c1_54 = arith.constant 1 : index
      %c0_55 = arith.constant 0 : index
      %c0_56 = arith.constant 0 : index
      %81 = vector.load %arg10[%c0_53, %c1_54, %c0_55, %c0_56] : memref<2x4x8x8xf32, #tpu.memory_space<vmem>>, vector<1x1x8x8xf32>
      %82 = vector.shape_cast %81 : vector<1x1x8x8xf32> to vector<8x8xf32>
      %83 = vector.shape_cast %80 : vector<8x8xf32> to vector<1x1x8x8xf32>
      tpu.vector_store %arg10[%c0_53, %c1_54, %c0_55, %c0_56], %83 {strides = array<i32>} : memref<2x4x8x8xf32, #tpu.memory_space<vmem>>, vector<1x1x8x8xf32>,
      %84 = vector.extract_strided_slice %71 {offsets = [40, 0], sizes = [8, 8], strides = [1, 1]} : vector<64x8xf32> to vector<8x8xf32>
      %c1_57 = arith.constant 1 : index
      %c1_58 = arith.constant 1 : index
      %c0_59 = arith.constant 0 : index
      %c0_60 = arith.constant 0 : index
      %85 = vector.load %arg10[%c1_57, %c1_58, %c0_59, %c0_60] : memref<2x4x8x8xf32, #tpu.memory_space<vmem>>, vector<1x1x8x8xf32>
      %86 = vector.shape_cast %85 : vector<1x1x8x8xf32> to vector<8x8xf32>
      %87 = vector.shape_cast %84 : vector<8x8xf32> to vector<1x1x8x8xf32>
      tpu.vector_store %arg10[%c1_57, %c1_58, %c0_59, %c0_60], %87 {strides = array<i32>} : memref<2x4x8x8xf32, #tpu.memory_space<vmem>>, vector<1x1x8x8xf32>,
      %88 = vector.extract_strided_slice %71 {offsets = [16, 0], sizes = [8, 8], strides = [1, 1]} : vector<64x8xf32> to vector<8x8xf32>
      %c0_61 = arith.constant 0 : index
      %c2_62 = arith.constant 2 : index
      %c0_63 = arith.constant 0 : index
      %c0_64 = arith.constant 0 : index
      %89 = vector.load %arg10[%c0_61, %c2_62, %c0_63, %c0_64] : memref<2x4x8x8xf32, #tpu.memory_space<vmem>>, vector<1x1x8x8xf32>
      %90 = vector.shape_cast %89 : vector<1x1x8x8xf32> to vector<8x8xf32>
      %91 = vector.shape_cast %88 : vector<8x8xf32> to vector<1x1x8x8xf32>
      tpu.vector_store %arg10[%c0_61, %c2_62, %c0_63, %c0_64], %91 {strides = array<i32>} : memref<2x4x8x8xf32, #tpu.memory_space<vmem>>, vector<1x1x8x8xf32>,
      %92 = vector.extract_strided_slice %71 {offsets = [48, 0], sizes = [8, 8], strides = [1, 1]} : vector<64x8xf32> to vector<8x8xf32>
      %c1_65 = arith.constant 1 : index
      %c2_66 = arith.constant 2 : index
      %c0_67 = arith.constant 0 : index
      %c0_68 = arith.constant 0 : index
      %93 = vector.load %arg10[%c1_65, %c2_66, %c0_67, %c0_68] : memref<2x4x8x8xf32, #tpu.memory_space<vmem>>, vector<1x1x8x8xf32>
      %94 = vector.shape_cast %93 : vector<1x1x8x8xf32> to vector<8x8xf32>
      %95 = vector.shape_cast %92 : vector<8x8xf32> to vector<1x1x8x8xf32>
      tpu.vector_store %arg10[%c1_65, %c2_66, %c0_67, %c0_68], %95 {strides = array<i32>} : memref<2x4x8x8xf32, #tpu.memory_space<vmem>>, vector<1x1x8x8xf32>,
      %96 = vector.extract_strided_slice %71 {offsets = [24, 0], sizes = [8, 8], strides = [1, 1]} : vector<64x8xf32> to vector<8x8xf32>
      %c0_69 = arith.constant 0 : index
      %c3_70 = arith.constant 3 : index
      %c0_71 = arith.constant 0 : index
      %c0_72 = arith.constant 0 : index
      %97 = vector.load %arg10[%c0_69, %c3_70, %c0_71, %c0_72] : memref<2x4x8x8xf32, #tpu.memory_space<vmem>>, vector<1x1x8x8xf32>
      %98 = vector.shape_cast %97 : vector<1x1x8x8xf32> to vector<8x8xf32>
      %99 = vector.shape_cast %96 : vector<8x8xf32> to vector<1x1x8x8xf32>
      tpu.vector_store %arg10[%c0_69, %c3_70, %c0_71, %c0_72], %99 {strides = array<i32>} : memref<2x4x8x8xf32, #tpu.memory_space<vmem>>, vector<1x1x8x8xf32>,
      %100 = vector.extract_strided_slice %71 {offsets = [56, 0], sizes = [8, 8], strides = [1, 1]} : vector<64x8xf32> to vector<8x8xf32>
      %c1_73 = arith.constant 1 : index
      %c3_74 = arith.constant 3 : index
      %c0_75 = arith.constant 0 : index
      %c0_76 = arith.constant 0 : index
      %101 = vector.load %arg10[%c1_73, %c3_74, %c0_75, %c0_76] : memref<2x4x8x8xf32, #tpu.memory_space<vmem>>, vector<1x1x8x8xf32>
      %102 = vector.shape_cast %101 : vector<1x1x8x8xf32> to vector<8x8xf32>
      %103 = vector.shape_cast %100 : vector<8x8xf32> to vector<1x1x8x8xf32>
      tpu.vector_store %arg10[%c1_73, %c3_74, %c0_75, %c0_76], %103 {strides = array<i32>} : memref<2x4x8x8xf32, #tpu.memory_space<vmem>>, vector<1x1x8x8xf32>,
    } else {
    }
    %c0 = arith.constant 0 : index
    %c0_1 = arith.constant 0 : index
    %c0_2 = arith.constant 0 : index
    %3 = vector.load %arg3[%c0, %c0_1, %c0_2] : memref<1x8x32xf32, #tpu.memory_space<vmem>>, vector<1x8x32xf32>
    %4 = vector.shape_cast %3 : vector<1x8x32xf32> to vector<8x32xf32>
    %c0_3 = arith.constant 0 : index
    %c0_4 = arith.constant 0 : index
    %5 = vector.load %arg4[%c0_3, %c0_4] : memref<32x32xf32, #tpu.memory_space<vmem>>, vector<32x32xf32>
    %cst = arith.constant dense<0.000000e+00> : vector<32x8xf32>
    %6 = tpu.matmul %5, %4, %cst {dimension_numbers = #tpu.dot_dimension_numbers<[1], [1], [0], [0], [0, 0, 1, 0], [], []>} : vector<32x32xf32>, vector<8x32xf32>, vector<32x8xf32> -> vector<32x8xf32>
    %7 = vector.extract_strided_slice %6 {offsets = [0, 0], sizes = [8, 8], strides = [1, 1]} : vector<32x8xf32> to vector<8x8xf32>
    %8 = tpu.transpose %7, [1, 0] : vector<8x8xf32> -> vector<8x8xf32>
    %9 = vector.extract_strided_slice %6 {offsets = [8, 0], sizes = [8, 8], strides = [1, 1]} : vector<32x8xf32> to vector<8x8xf32>
    %10 = tpu.transpose %9, [1, 0] : vector<8x8xf32> -> vector<8x8xf32>
    %11 = vector.extract_strided_slice %6 {offsets = [16, 0], sizes = [8, 8], strides = [1, 1]} : vector<32x8xf32> to vector<8x8xf32>
    %12 = tpu.transpose %11, [1, 0] : vector<8x8xf32> -> vector<8x8xf32>
    %13 = vector.extract_strided_slice %6 {offsets = [24, 0], sizes = [8, 8], strides = [1, 1]} : vector<32x8xf32> to vector<8x8xf32>
    %14 = tpu.transpose %13, [1, 0] : vector<8x8xf32> -> vector<8x8xf32>
    %15 = vector.shape_cast %8 : vector<8x8xf32> to vector<1x8x8xf32>
    %16 = vector.shape_cast %10 : vector<8x8xf32> to vector<1x8x8xf32>
    %17 = vector.shape_cast %12 : vector<8x8xf32> to vector<1x8x8xf32>
    %18 = vector.shape_cast %14 : vector<8x8xf32> to vector<1x8x8xf32>
    %19 = tpu.concatenate %15, %16, %17, %18 in 0 : vector<1x8x8xf32>, vector<1x8x8xf32>, vector<1x8x8xf32>, vector<1x8x8xf32> -> vector<4x8x8xf32>
    %c0_5 = arith.constant 0 : index
    %c0_6 = arith.constant 0 : index
    %c0_7 = arith.constant 0 : index
    %c0_8 = arith.constant 0 : index
    %20 = vector.load %arg10[%c0_5, %c0_6, %c0_7, %c0_8] : memref<2x4x8x8xf32, #tpu.memory_space<vmem>>, vector<1x4x8x8xf32>
    %21 = vector.shape_cast %20 : vector<1x4x8x8xf32> to vector<4x8x8xf32>
    %c1 = arith.constant 1 : index
    %c0_9 = arith.constant 0 : index
    %c0_10 = arith.constant 0 : index
    %c0_11 = arith.constant 0 : index
    %22 = vector.load %arg10[%c1, %c0_9, %c0_10, %c0_11] : memref<2x4x8x8xf32, #tpu.memory_space<vmem>>, vector<1x4x8x8xf32>
    %23 = vector.shape_cast %22 : vector<1x4x8x8xf32> to vector<4x8x8xf32>
    %cst_12 = arith.constant dense<0.000000e+00> : vector<4x8x8xf32>
    %24 = tpu.matmul %19, %21, %cst_12 {dimension_numbers = #tpu.dot_dimension_numbers<[2], [1], [1], [2], [0, 0, 0, 1, 1, 2], [0], [0]>} : vector<4x8x8xf32>, vector<4x8x8xf32>, vector<4x8x8xf32> -> vector<4x8x8xf32>
    %cst_13 = arith.constant dense<0xFF800000> : vector<4x8xf32>
    %25 = vector.multi_reduction <maximumf>, %24, %cst_13 [2] : vector<4x8x8xf32> to vector<4x8xf32>
    %26 = vector.shape_cast %25 : vector<4x8xf32> to vector<4x8x1xf32>
    %27 = vector.broadcast %26 : vector<4x8x1xf32> to vector<4x8x8xf32>
    %28 = arith.subf %24, %27 : vector<4x8x8xf32>
    %29 = math.exp %28 : vector<4x8x8xf32>
    %cst_14 = arith.constant dense<0.000000e+00> : vector<4x8xf32>
    %30 = vector.multi_reduction <add>, %29, %cst_14 [2] : vector<4x8x8xf32> to vector<4x8xf32>
    %31 = vector.shape_cast %30 : vector<4x8xf32> to vector<4x8x1xf32>
    %32 = tpu.reciprocal %31 : vector<4x8x1xf32> -> vector<4x8x1xf32>
    %33 = vector.broadcast %32 : vector<4x8x1xf32> to vector<4x8x8xf32>
    %34 = arith.mulf %29, %33 : vector<4x8x8xf32>
    %cst_15 = arith.constant dense<0.000000e+00> : vector<4x8x8xf32>
    %35 = tpu.matmul %34, %23, %cst_15 {dimension_numbers = #tpu.dot_dimension_numbers<[2], [2], [1], [1], [0, 0, 0, 1, 1, 1], [0], [0]>} : vector<4x8x8xf32>, vector<4x8x8xf32>, vector<4x8x8xf32> -> vector<4x8x8xf32>
    %36 = vector.extract_strided_slice %35 {offsets = [0, 0, 0], sizes = [1, 8, 8], strides = [1, 1, 1]} : vector<4x8x8xf32> to vector<1x8x8xf32>
    %37 = vector.shape_cast %36 : vector<1x8x8xf32> to vector<8x8xf32>
    %c0_16 = arith.constant 0 : index
    %c0_17 = arith.constant 0 : index
    %c0_18 = arith.constant 0 : index
    %38 = vector.load %arg6[%c0_16, %c0_17, %c0_18] : memref<4x8x32xf32, #tpu.memory_space<vmem>>, vector<1x8x32xf32>
    %39 = vector.shape_cast %38 : vector<1x8x32xf32> to vector<8x32xf32>
    %cst_19 = arith.constant dense<0.000000e+00> : vector<8x32xf32>
    %40 = tpu.matmul %37, %39, %cst_19 {dimension_numbers = #tpu.dot_dimension_numbers<[1], [0], [0], [1], [0, 0, 1, 1], [], []>} : vector<8x8xf32>, vector<8x32xf32>, vector<8x32xf32> -> vector<8x32xf32>
    %41 = vector.extract_strided_slice %35 {offsets = [1, 0, 0], sizes = [1, 8, 8], strides = [1, 1, 1]} : vector<4x8x8xf32> to vector<1x8x8xf32>
    %42 = vector.shape_cast %41 : vector<1x8x8xf32> to vector<8x8xf32>
    %c1_20 = arith.constant 1 : index
    %c0_21 = arith.constant 0 : index
    %c0_22 = arith.constant 0 : index
    %43 = vector.load %arg6[%c1_20, %c0_21, %c0_22] : memref<4x8x32xf32, #tpu.memory_space<vmem>>, vector<1x8x32xf32>
    %44 = vector.shape_cast %43 : vector<1x8x32xf32> to vector<8x32xf32>
    %cst_23 = arith.constant dense<0.000000e+00> : vector<8x32xf32>
    %45 = tpu.matmul %42, %44, %cst_23 {dimension_numbers = #tpu.dot_dimension_numbers<[1], [0], [0], [1], [0, 0, 1, 1], [], []>} : vector<8x8xf32>, vector<8x32xf32>, vector<8x32xf32> -> vector<8x32xf32>
    %46 = arith.addf %40, %45 : vector<8x32xf32>
    %47 = vector.extract_strided_slice %35 {offsets = [2, 0, 0], sizes = [1, 8, 8], strides = [1, 1, 1]} : vector<4x8x8xf32> to vector<1x8x8xf32>
    %48 = vector.shape_cast %47 : vector<1x8x8xf32> to vector<8x8xf32>
    %c2 = arith.constant 2 : index
    %c0_24 = arith.constant 0 : index
    %c0_25 = arith.constant 0 : index
    %49 = vector.load %arg6[%c2, %c0_24, %c0_25] : memref<4x8x32xf32, #tpu.memory_space<vmem>>, vector<1x8x32xf32>
    %50 = vector.shape_cast %49 : vector<1x8x32xf32> to vector<8x32xf32>
    %cst_26 = arith.constant dense<0.000000e+00> : vector<8x32xf32>
    %51 = tpu.matmul %48, %50, %cst_26 {dimension_numbers = #tpu.dot_dimension_numbers<[1], [0], [0], [1], [0, 0, 1, 1], [], []>} : vector<8x8xf32>, vector<8x32xf32>, vector<8x32xf32> -> vector<8x32xf32>
    %52 = arith.addf %46, %51 : vector<8x32xf32>
    %53 = vector.extract_strided_slice %35 {offsets = [3, 0, 0], sizes = [1, 8, 8], strides = [1, 1, 1]} : vector<4x8x8xf32> to vector<1x8x8xf32>
    %54 = vector.shape_cast %53 : vector<1x8x8xf32> to vector<8x8xf32>
    %c3 = arith.constant 3 : index
    %c0_27 = arith.constant 0 : index
    %c0_28 = arith.constant 0 : index
    %55 = vector.load %arg6[%c3, %c0_27, %c0_28] : memref<4x8x32xf32, #tpu.memory_space<vmem>>, vector<1x8x32xf32>
    %56 = vector.shape_cast %55 : vector<1x8x32xf32> to vector<8x32xf32>
    %cst_29 = arith.constant dense<0.000000e+00> : vector<8x32xf32>
    %57 = tpu.matmul %54, %56, %cst_29 {dimension_numbers = #tpu.dot_dimension_numbers<[1], [0], [0], [1], [0, 0, 1, 1], [], []>} : vector<8x8xf32>, vector<8x32xf32>, vector<8x32xf32> -> vector<8x32xf32>
    %58 = arith.addf %52, %57 : vector<8x32xf32>
    %c0_30 = arith.constant 0 : index
    %c0_31 = arith.constant 0 : index
    %59 = vector.load %arg7[%c0_30, %c0_31] : memref<1x32xf32, #tpu.memory_space<vmem>>, vector<1x32xf32>
    %60 = vector.broadcast %59 : vector<1x32xf32> to vector<8x32xf32>
    %61 = arith.addf %58, %60 : vector<8x32xf32>
    %c0_32 = arith.constant 0 : index
    %c0_33 = arith.constant 0 : index
    %c0_34 = arith.constant 0 : index
    %62 = vector.load %arg8[%c0_32, %c0_33, %c0_34] : memref<1x8x32xf32, #tpu.memory_space<vmem>>, vector<1x8x32xf32>
    %63 = vector.shape_cast %62 : vector<1x8x32xf32> to vector<8x32xf32>
    %64 = vector.shape_cast %61 : vector<8x32xf32> to vector<1x8x32xf32>
    tpu.vector_store %arg8[%c0_32, %c0_33, %c0_34], %64 {strides = array<i32>} : memref<1x8x32xf32, #tpu.memory_space<vmem>>, vector<1x8x32xf32>,
    %c0_35 = arith.constant 0 : index
    %c0_36 = arith.constant 0 : index
    %c0_37 = arith.constant 0 : index
    %c0_38 = arith.constant 0 : index
    %65 = vector.load %arg9[%c0_35, %c0_36, %c0_37, %c0_38] : memref<1x4x8x8xf32, #tpu.memory_space<vmem>>, vector<1x4x8x8xf32>
    %66 = vector.shape_cast %65 : vector<1x4x8x8xf32> to vector<4x8x8xf32>
    %67 = vector.shape_cast %34 : vector<4x8x8xf32> to vector<1x4x8x8xf32>
    tpu.vector_store %arg9[%c0_35, %c0_36, %c0_37, %c0_38], %67 {strides = array<i32>} : memref<1x4x8x8xf32, #tpu.memory_space<vmem>>, vector<1x4x8x8xf32>,
    return
  }
  func.func @transform_0(%arg0: i32, %arg1: i32) -> (i32, i32, i32) {
    %c0_i32 = arith.constant 0 : i32
    %c0_i32_0 = arith.constant 0 : i32
    %c0_i32_1 = arith.constant 0 : i32
    return %arg0, %c0_i32, %c0_i32_0 : i32, i32, i32
  }
  func.func @transform_1(%arg0: i32, %arg1: i32) -> (i32, i32, i32) {
    %c0_i32 = arith.constant 0 : i32
    %c0_i32_0 = arith.constant 0 : i32
    return %arg0, %arg1, %c0_i32 : i32, i32, i32
  }
  func.func @transform_2(%arg0: i32, %arg1: i32) -> (i32, i32) {
    %c0_i32 = arith.constant 0 : i32
    %c0_i32_0 = arith.constant 0 : i32
    %c0_i32_1 = arith.constant 0 : i32
    return %c0_i32, %c0_i32_0 : i32, i32
  }
  func.func @transform_3(%arg0: i32, %arg1: i32) -> (i32, i32) {
    %c0_i32 = arith.constant 0 : i32
    %c0_i32_0 = arith.constant 0 : i32
    %c0_i32_1 = arith.constant 0 : i32
    return %c0_i32, %c0_i32_0 : i32, i32
  }
  func.func @transform_4(%arg0: i32, %arg1: i32) -> (i32, i32, i32) {
    %c0_i32 = arith.constant 0 : i32
    %c0_i32_0 = arith.constant 0 : i32
    %c0_i32_1 = arith.constant 0 : i32
    %c0_i32_2 = arith.constant 0 : i32
    return %c0_i32, %c0_i32_0, %c0_i32_1 : i32, i32, i32
  }
  func.func @transform_5(%arg0: i32, %arg1: i32) -> (i32, i32) {
    %c0_i32 = arith.constant 0 : i32
    %c0_i32_0 = arith.constant 0 : i32
    %c0_i32_1 = arith.constant 0 : i32
    return %c0_i32, %c0_i32_0 : i32, i32
  }
  func.func @transform_6(%arg0: i32, %arg1: i32) -> (i32, i32, i32) {
    %c0_i32 = arith.constant 0 : i32
    %c0_i32_0 = arith.constant 0 : i32
    return %arg0, %arg1, %c0_i32 : i32, i32, i32
  }
  func.func @transform_7(%arg0: i32, %arg1: i32) -> (i32, i32, i32, i32) {
    %c0_i32 = arith.constant 0 : i32
    %c0_i32_0 = arith.constant 0 : i32
    %c0_i32_1 = arith.constant 0 : i32
    return %arg0, %c0_i32, %arg1, %c0_i32_0 : i32, i32, i32, i32
  }
}

</mosaic_0001>

<bundles_post_ra>
// kernel: tpu_custom_call.1
= control target key start
LH: loop header
LB: loop body
LE: loop exit
PB: predicated region body
PF: predicated region fallthrough
CT: control target
= control target key end

     0   :  { %13 = vsyncpa [#allocation4], 0  ;;  %s2551_s0 = inlined_call_operand.vmem [shape: f32[2,8,32], index: 0, kind: input, shape index: {}]   ;;  %s2552_s1 = inlined_call_operand.vmem [shape: f32[2,8,32], index: 1, kind: input, shape index: {}]   ;;  %s2553_s2 = inlined_call_operand.vmem [shape: f32[32,32], index: 2, kind: input, shape index: {}]   ;;  %s2554_s3 = inlined_call_operand.vmem [shape: f32[64,32], index: 3, kind: input, shape index: {}]   ;;  %s2555_s4 = inlined_call_operand.vmem [shape: f32[4,8,32], index: 4, kind: input, shape index: {}]   ;;  %s2556_s5 = inlined_call_operand.vmem [shape: f32[1,32], index: 5, kind: input, shape index: {}]   ;;  %s2557_s6 = inlined_call_operand.hbm [shape: f32[2,8,32], index: 6, kind: output, shape index: {0}]   ;;  %s2558_s7 = inlined_call_operand.hbm [shape: f32[2,4,8,8], index: 7, kind: output, shape index: {1}]  }
   0x1   :  { %15 = vsyncpa [#allocation4 + $0x1], 0 }
   0x2   :  { %16 = vsyncpa [#allocation6], 0 }
   0x3   :  { %18 = vsyncpa [#allocation6 + $0x1], 0  ;;  %s2252_s24 = smov 0   ;;  %s2254_s25 = smov 0  }
   0x4   :  { %s2256_s26 = smov 0   ;;  %s2258_s27 = smov 0  }
   0x5   :  { %s2260_s28 = smov 0   ;;  %s2262_s29 = smov 0  }
   0x6 LB: > { %s1843_s30 = sadd.s32 4294967295, %s2204_s29   ;;  %s1844_s8 = sadd.s32 4294967294, %s2204_s29   ;;  %s2204_s29 = sphi %s2262_s29, %s24_s29   ;;  %s2200_s28 = sphi %s2260_s28, %s2565_s28   ;;  %s2196_s27 = sphi %s2258_s27, %s2564_s27   ;;  %s2192_s26 = sphi %s2256_s26, %s2563_s26   ;;  %s2188_s25 = sphi %s2254_s25, %s2562_s25   ;;  %s2184_s24 = sphi %s2252_s24, %s2561_s24  }
   0x7   : > { %s36_s9 = sadd.s32 1, %s2200_s28  ;;  %s183_s10 = sadd.s32 1, %s2192_s26 }
   0x8   : > { %p38_p0 = scmp.ge.s32.totalorder %s36_s9, 2  ;;  %p193_p1 = scmp.ne.s32.totalorder %s2192_s26, %s2188_s25 }
   0x9   : > { %p194_p2 = scmp.eq.s32.totalorder %s1843_s30, 1  ;;  %p199_p3 = scmp.ne.s32.totalorder %s2188_s25, %s2184_s24 }
   0xa   : > { %s2567_s9 = smov (%p38_p0, %s36_s9), 0  ;;  %p200_p5 = scmp.eq.s32.totalorder %s1844_s8, 1 }
   0xb   : > { %p2292_p4 = por %p194_p2, %p193_p1  ;;  %s178_s12 = ssub.s32 %s2200_s28, %s2567_s9 }
   0xc   : > { %p1847_p6 = scmp.ge.s32.totalorder %s2204_s29, 1  ;;  %p181_p7 = scmp.eq.s32.totalorder %s178_s12, 0 }
   0xd   : > { %p2299_p8 = por %p200_p5, %p199_p3  ;;  %p275_p9 = scmp.lt.s32.totalorder %s2204_s29, 3 }
   0xe   : > { %s2305_s14 = scalar_select %p181_p7, %s2192_s26, %s183_s10  }
   0xf   : > { %p276_p10 = pnand %p1847_p6, %p275_p9 }
  0x10   : > { %p318_p11 = scmp.lt.s32.totalorder (!%p276_p10), %s2196_s27, 1  ;;  %vm342_vm0 = vcmask (!%p276_p10), 261120   ;;  %v492_v0 = vld [vmem:[%s2553_s2] sm:$0xff] (!%p276_p10)  ;;  %v493_v4 = vld [vmem:[%s2553_s2 + $0x8] sm:$0xff] (!%p276_p10)  ;;  %v494_v6 = vld [vmem:[%s2553_s2 + $0x10] sm:$0xff] (!%p276_p10)  ;;  %v2206_v10 = vmov (!%p276_p10), 0.0  }
  0x11   : > { %279 = sbr.rel (%p276_p10) target bundleno = 1355 (0x54b), region = 44  ;;  %1948 = vmatprep.mubr.msk.f32.mxu1 (!%p276_p10), %vm342_vm0, %v492_v0  ;;  %v334_v1 = vld [vmem:[%s2554_s3] sm:$0xff] (!%p276_p10)  ;;  %v335_v5 = vld [vmem:[%s2554_s3 + $0x8] sm:$0xff] (!%p276_p10)  ;;  %v336_v7 = vld [vmem:[%s2554_s3 + $0x10] sm:$0xff] (!%p276_p10)  ;;  %vm2207_vm1 = vmmov (!%p276_p10), 0   ;;  %vm475_vm2 = vcmask (!%p276_p10), 64512  }
  0x12   : > { %1934 = vmatprep.mubr.msk.f32.mxu0 (!%p276_p10), %vm342_vm0, %v334_v1  ;;  %v495_v8 = vld [vmem:[%s2553_s2 + $0x18] sm:$0xff] (!%p276_p10)  ;;  %v338_v11 = vld [vmem:[%s2554_s3 + $0x20] sm:$0xff] (!%p276_p10)  ;;  %v339_v16 = vld [vmem:[%s2554_s3 + $0x28] sm:$0xff] (!%p276_p10)  ;;  %s2410_s21 = sand.u32 (!%p276_p10), 1, %s2188_s25   ;;  %s2208_s15 = smov (!%p276_p10), [#allocation5]  }
  0x13   : > { %v337_v9 = vld [vmem:[%s2554_s3 + $0x18] sm:$0xff] (!%p276_p10)  ;;  %v340_v19 = vld [vmem:[%s2554_s3 + $0x30] sm:$0xff] (!%p276_p10)  ;;  %s1849_s22 = sshll.u32 (!%p276_p10), %s2410_s21, 5  ;;  %s2098_s16 = sshll.u32 (!%p276_p10), %s2208_s15, 4  ;;  %s2099_s16 = int_to_ptr.vmem [resolvable:$false] %s2098_s16 }
  0x14   : > { %v341_v22 = vld [vmem:[%s2554_s3 + $0x38] sm:$0xff] (!%p276_p10) }
  0x18   : > { %s319_s19 = scalar_select %p318_p11, %s2196_s27, 1 }
  0x1a   : > { %s1850_s20 = sshll.u32 %s319_s19, 3 }
  0x1b   : > { %s328_s23 = scalar_lea.vmem %s2552_s1, %s1850_s20  ;;  %s321_s10 = scalar_lea.vmem %s2551_s0, %s1850_s20 }
  0x1c   : > { %v491_v2 = vld [vmem:[%s328_s23] sm:$0xff]  ;;  %s2414_s23 = scalar_lea.vmem [#allocation5], %s1849_s22  ;;  %s1893_s20 = sshll.u32 %s2196_s27, 9 }
  0x1d   : > { %v333_v3 = vld [vmem:[%s321_s10] sm:$0xff]  ;;  %1946 = vmatprep.subr.msk.mxu1 %vm342_vm0, %v491_v2  ;;  %s1723_s19 = sshll.u32 %s2414_s23, 4  ;;  %s2468_s8 = scalar_lea.hbm %s2558_s7, %s1893_s20  ;;  %s2463_s19 = int_to_ptr.vmem [resolvable:$true] %s1723_s19 }
  0x1e   : > { %1932 = vmatprep.subr.msk.mxu0 %vm342_vm0, %v333_v3  ;;  %1947 = vmatpush3.xpose.msk.msra.mxu1 %vm342_vm0, %v491_v2  ;;  %s1695_s10 = scalar_lea.sflag [#allocation6], %s2410_s21  ;;  %s2094_s12 = scalar_lea.vmem %s2463_s19, 512 }
  0x1f   : > { %1933 = vmatpush3.xpose.msk.msra.mxu0 %vm342_vm0, %v333_v3  ;;  %1954 = vmatprep.subr.mxu1 %v2206_v10  ;;  %p2095_p12 = scmp.ne.s32.totalorder %s2463_s19, %s2094_s12  ;;  %p2101_p1 = scmp.lt.s32.totalorder %s2463_s19, %s2099_s16 }
  0x20   : > { %1964 = vmatprep.subr.mxu0 %v2206_v10 }
  0x21   : > { %1949 = vmatmul.mubr.msk.f32.vlgmr.msra.gmra.mrb[0].mxu1 %vm342_vm0, %v493_v4  ;;  %p2096_p13 = pnand %p2095_p12, %p2292_p4 }
  0x22   : > { %1935 = vmatmul.mubr.msk.f32.vlgmr.msra.gmra.mrb[0].mxu0 %vm342_vm0, %v335_v5  ;;  %1951 = vmatprep.mubr.msk.f32.mxu1 %vm342_vm0, %v494_v6 }
  0x23   : > { %1937 = vmatprep.mubr.msk.f32.mxu0 %vm342_vm0, %v336_v7  ;;  %p2097_p0 = pneg %p2096_p13 }
  0x25   : > { %1952 = vmatmul.mubr.msk.f32.gmra.mrb[2].mxu1 %vm342_vm0, %v495_v8 }
  0x26   : > { %1938 = vmatmul.mubr.msk.f32.gmra.mrb[2].mxu0 %vm342_vm0, %v337_v9  ;;  %1956 = vmatprep.mubr.msk.f32.mxu1 %vm2207_vm1, %v2206_v10 }
  0x27   : > { %1940 = vmatprep.mubr.msk.f32.mxu0 %vm342_vm0, %v338_v11 }
  0x2a   : > { %1941 = vmatmul.mubr.msk.f32.gmra.mrb[4].mxu0 %vm342_vm0, %v339_v16 }
  0x2b   : > { %1943 = vmatprep.mubr.msk.f32.mxu0 %vm342_vm0, %v340_v19 }
  0x2e   : > { %1944 = vmatmul.mubr.msk.f32.gmra.mrb[6].mxu0 %vm342_vm0, %v341_v22  ;;  %v1883_v22 = vld [vmem:[%s2555_s4 + $0x18] sm:$0xff] }
  0x2f   : > { %1966 = vmatprep.mubr.msk.f32.mxu0 %vm2207_vm1, %v2206_v10 }
  0xf4   : > { %v1950_v12 = vpop.f32.mrb[0].mxu1 }
  0xf5   : > { %v1936_v13 = vpop.f32.mrb[0].mxu0  ;;  %v578_v14 = vpop.f32.mrb[1].mxu1 }
  0xf6   : > { %480 = vst.msk [vmem:[#allocation2 + $0x8] sm:$0xff] %vm475_vm2, %v1936_v13  ;;  %v436_v15 = vpop.f32.mrb[1].mxu0  ;;  %597 = vxpose.xlu0.b32.start.end [1/1] (short) (narrow) %v578_v14, 8 }
  0xf7   : > { %476 = vst.msk [vmem:[#allocation2] sm:$0xff] %vm475_vm2, %v436_v15 }
  0xf8   : > { %v1953_v17 = vpop.f32.mrb[2].mxu1 }
  0xf9   : > { %v1939_v18 = vpop.f32.mrb[2].mxu0  ;;  %v588_v20 = vpop.f32.mrb[3].mxu1 }
  0xfa   : > { %488 = vst.msk [vmem:[#allocation2 + $0x18] sm:$0xff] %vm475_vm2, %v1939_v18  ;;  %v446_v21 = vpop.f32.mrb[3].mxu0  ;;  %629 = vxpose.xlu0.b32.start.end [1/1] (short) (narrow) %v1950_v12, 8  ;;  %661 = vxpose.xlu1.b32.start.end [1/1] (short) (narrow) %v588_v20, 8  ;;  %v1375_v20 = vld [vmem:[%s2555_s4] sm:$0xff] }
  0xfb   : > { %484 = vst.msk [vmem:[#allocation2 + $0x10] sm:$0xff] %vm475_vm2, %v446_v21  ;;  %v1878_v21 = vld [vmem:[%s2555_s4 + $0x8] sm:$0xff] }
  0xfd   : > { %v726_v26 = vld [vmem:[#allocation2 + $0x8] sm:$0xff]  ;;  %v1942_v31 = vpop.f32.mrb[4].mxu0 }
  0xfe   : > { %v725_v23 = vld [vmem:[#allocation2] sm:$0xff]  ;;  %693 = vxpose.xlu1.b32.start.end [1/1] (short) (narrow) %v1953_v17, 8  ;;  %482 = vst.msk [vmem:[#allocation2 + $0x28] sm:$0xff] %vm475_vm2, %v1942_v31  ;;  %v456_v32 = vpop.f32.mrb[5].mxu0 }
  0xff   : > { %1955 = vmatpush3.msra.mxu1 %v725_v23  ;;  %478 = vst.msk [vmem:[#allocation2 + $0x20] sm:$0xff] %vm475_vm2, %v456_v32 }
 0x100   : > { %1959 = vmatprep.subr.mxu1 %v2206_v10 }
 0x101   : > { %v728_v27 = vld [vmem:[#allocation2 + $0x18] sm:$0xff]  ;;  %v1945_v33 = vpop.f32.mrb[6].mxu0 }
 0x102   : > { %v727_v24 = vld [vmem:[#allocation2 + $0x10] sm:$0xff]  ;;  %490 = vst.msk [vmem:[#allocation2 + $0x38] sm:$0xff] %vm475_vm2, %v1945_v33  ;;  %v466_v34 = vpop.f32.mrb[7].mxu0 }
 0x103   : > { %1965 = vmatpush3.msra.mxu0 %v727_v24  ;;  %486 = vst.msk [vmem:[#allocation2 + $0x30] sm:$0xff] %vm475_vm2, %v466_v34 }
 0x104   : > { %1974 = vmatprep.subr.mxu0 %v2206_v10 }
 0x105   : > { %v731_v35 = vld [vmem:[#allocation2 + $0x28] sm:$0xff] }
 0x106   : > { %v730_v36 = vld [vmem:[#allocation2 + $0x20] sm:$0xff] }
 0x109   : > { %v733_v15 = vld [vmem:[#allocation2 + $0x38] sm:$0xff] }
 0x10a   : > { %v732_v12 = vld [vmem:[#allocation2 + $0x30] sm:$0xff] }
 0x176   : > { %v613_v25 = vpop.trf.xlu0 }
 0x177   : > { %1957 = vmatmul.mubr.msk.f32.vlgmr.msra.gmra.mrb[4].mxu1 %vm475_vm2, %v613_v25  ;;  %v1881_v25 = vld [vmem:[%s2555_s4 + $0x10] sm:$0xff] }
 0x178   : > { %1960 = vmatpush3.msra.mxu1 %v726_v26  ;;  %1961 = vmatprep.mubr.msk.f32.mxu1 %vm2207_vm1, %v2206_v10 }
 0x179   : > { %1969 = vmatprep.subr.mxu1 %v2206_v10 }
 0x17a   : > { %v645_v28 = vpop.trf.xlu0  ;;  %v677_v29 = vpop.trf.xlu1 }
 0x17b   : > { %1962 = vmatmul.mubr.msk.f32.vlgmr.msra.gmra.mrb[6].mxu1 %vm475_vm2, %v645_v28  ;;  %1967 = vmatmul.mubr.msk.f32.vlgmr.msra.gmra.mrb[8].mxu0 %vm475_vm2, %v677_v29 }
 0x17c   : > { %1970 = vmatpush3.msra.mxu1 %v728_v27  ;;  %1971 = vmatprep.mubr.msk.f32.mxu1 %vm2207_vm1, %v2206_v10 }
 0x17d   : > { %1979 = vmatprep.subr.mxu1 %v2206_v10  ;;  %1976 = vmatprep.mubr.msk.f32.mxu0 %vm2207_vm1, %v2206_v10 }
 0x17e   : > { %v709_v30 = vpop.trf.xlu1  ;;  %1975 = vmatpush3.xpose.msk.msra.mxu0 %vm475_vm2, %v730_v36 }
 0x17f   : > { %1972 = vmatmul.mubr.msk.f32.vlgmr.msra.gmra.mrb[8].mxu1 %vm475_vm2, %v709_v30  ;;  %1984 = vmatprep.subr.mxu0 %v2206_v10 }
 0x180   : > { %1981 = vmatprep.mubr.msk.f32.mxu1 %vm2207_vm1, %v2206_v10 }
 0x183   : > { %1980 = vmatpush3.xpose.msk.msra.mxu1 %vm475_vm2, %v731_v35 }
 0x184   : > { %1989 = vmatprep.subr.mxu1 %v2206_v10 }
 0x24a   : > { %v804_v37 = vpop.f32.mrb[4].mxu1 }
 0x24b   : > { %v1958_v38 = vpop.f32.mrb[5].mxu1  ;;  %v1027_v39 = vsel %vm475_vm2, %v804_v37, -inf }
 0x24c   : > { %1028 = vmax.xlane.f32.xlu0 %v1027_v39 }
 0x24e   : > { %v877_v40 = vpop.f32.mrb[6].mxu1  ;;  %v950_v41 = vpop.f32.mrb[8].mxu0 }
 0x24f   : > { %v1963_v42 = vpop.f32.mrb[7].mxu1  ;;  %v1030_v43 = vsel %vm475_vm2, %v877_v40, -inf  ;;  %v1968_v44 = vpop.f32.mrb[9].mxu0  ;;  %v1033_v45 = vsel %vm475_vm2, %v950_v41, -inf }
 0x250   : > { %1031 = vmax.xlane.f32.xlu1 %v1030_v43 }
 0x252   : > { %v1023_v46 = vpop.f32.mrb[8].mxu1 }
 0x253   : > { %v1973_v47 = vpop.f32.mrb[9].mxu1  ;;  %v1036_v48 = vsel %vm475_vm2, %v1023_v46, -inf }
 0x254   : > { %1034 = vmax.xlane.f32.xlu1 %v1033_v45 }
 0x258   : > { %1037 = vmax.xlane.f32.xlu1 %v1036_v48 }
 0x2d9   : > { %v1029_v49 = vpop.xlane.xlu0 %1028 }
 0x2da   : > { %v1039_v50 = vsub.f32 %v804_v37, %v1029_v49 }
 0x2dc   : > { %v1043_v51 = vmul.f32 1.442695, %v1039_v50 }
 0x2dd   : > { %v1032_v52 = vpop.xlane.xlu1 %1031 }
 0x2de   : > { %2078 = vpow2.f32 %v1043_v51  ;;  %v1040_v53 = vsub.f32 %v877_v40, %v1032_v52 }
 0x2e0   : > { %v1045_v54 = vmul.f32 1.442695, %v1040_v53 }
 0x2e1   : > { %v1035_v55 = vpop.xlane.xlu1 %1034 }
 0x2e2   : > { %2080 = vpow2.f32 %v1045_v54  ;;  %v1041_v56 = vsub.f32 %v950_v41, %v1035_v55 }
 0x2e4   : > { %v1047_v57 = vmul.f32 1.442695, %v1041_v56 }
 0x2e5   : > { %v1038_v58 = vpop.xlane.xlu1 %1037 }
 0x2e6   : > { %2082 = vpow2.f32 %v1047_v57  ;;  %v1042_v59 = vsub.f32 %v1023_v46, %v1038_v58 }
 0x2e8   : > { %v2079_v60 = vpop.eup %2078  ;;  %v1049_v61 = vmul.f32 1.442695, %v1042_v59 }
 0x2e9   : > { %v1051_v62 = vsel %vm475_vm2, %v2079_v60, 0.0 }
 0x2ea   : > { %2084 = vpow2.f32 %v1049_v61  ;;  %1052 = vadd.xlane.f32.xlu0 %v1051_v62 }
 0x2ec   : > { %v2081_v63 = vpop.eup %2080 }
 0x2ed   : > { %v1054_v0 = vsel %vm475_vm2, %v2081_v63, 0.0 }
 0x2ee   : > { %1055 = vadd.xlane.f32.xlu1 %v1054_v0 }
 0x2f0   : > { %v2083_v1 = vpop.eup %2082 }
 0x2f1   : > { %v1057_v2 = vsel %vm475_vm2, %v2083_v1, 0.0 }
 0x2f2   : > { %1058 = vadd.xlane.f32.xlu0 %v1057_v2 }
 0x2f4   : > { %v2085_v3 = vpop.eup %2084 }
 0x2f5   : > { %v1060_v4 = vsel %vm475_vm2, %v2085_v3, 0.0 }
 0x2f6   : > { %1061 = vadd.xlane.f32.xlu1 %v1060_v4 }
 0x377   : > { %v1053_v5 = vpop.xlane.xlu0 %1052 }
 0x378   : > { %2086 = vrcp.f32 %v1053_v5 }
 0x37b   : > { %v1056_v6 = vpop.xlane.xlu1 %1055 }
 0x37c   : > { %2088 = vrcp.f32 %v1056_v6 }
 0x37f   : > { %v1059_v7 = vpop.xlane.xlu0 %1058 }
 0x380   : > { %2090 = vrcp.f32 %v1059_v7 }
 0x382   : > { %v2087_v8 = vpop.eup %2086 }
 0x383   : > { %v1067_v9 = vmul.f32 %v2087_v8, %v2079_v60  ;;  %v1062_v11 = vpop.xlane.xlu1 %1061 }
 0x384   : > { %2092 = vrcp.f32 %v1062_v11 }
 0x385   : > { %1977 = vmatmul.mubr.msk.f32.vlgmr.msra.gmra.mrb[10].mxu0 %vm475_vm2, %v1067_v9  ;;  %1685 = vst.msk [vmem:[%s2414_s23] sm:$0xff] %vm475_vm2, %v1067_v9 }
 0x386   : > { %v2089_v13 = vpop.eup %2088  ;;  %1985 = vmatpush3.xpose.msk.msra.mxu0 %vm475_vm2, %v732_v12  ;;  %1986 = vmatprep.mubr.msk.f32.mxu0 %vm2207_vm1, %v2206_v10 }
 0x387   : > { %v1068_v14 = vmul.f32 %v2089_v13, %v2081_v63  ;;  %1994 = vmatprep.subr.mxu0 %v2206_v10 }
 0x389   : > { %1982 = vmatmul.mubr.msk.f32.vlgmr.msra.gmra.mrb[10].mxu1 %vm475_vm2, %v1068_v14  ;;  %1686 = vst.msk [vmem:[%s2414_s23 + $0x8] sm:$0xff] %vm475_vm2, %v1068_v14 }
 0x38a   : > { %v2091_v16 = vpop.eup %2090  ;;  %1990 = vmatpush3.xpose.msk.msra.mxu1 %vm475_vm2, %v733_v15  ;;  %1991 = vmatprep.mubr.msk.f32.mxu1 %vm2207_vm1, %v2206_v10 }
 0x38b   : > { %v1069_v17 = vmul.f32 %v2091_v16, %v2083_v1  ;;  %1999 = vmatprep.subr.mxu1 %v2206_v10 }
 0x38d   : > { %1987 = vmatmul.mubr.msk.f32.vlgmr.msra.gmra.mrb[12].mxu0 %vm475_vm2, %v1069_v17  ;;  %1687 = vst.msk [vmem:[%s2414_s23 + $0x10] sm:$0xff] %vm475_vm2, %v1069_v17 }
 0x38e   : > { %v2093_v18 = vpop.eup %2092  ;;  %1996 = vmatprep.mubr.msk.f32.mxu0 %vm2207_vm1, %v2206_v10  ;;  %1995 = vmatpush3.msra.mxu0 %v1878_v21 }
 0x38f   : > { %v1070_v19 = vmul.f32 %v2093_v18, %v2085_v3  ;;  %2004 = vmatprep.subr.mxu0 %v2206_v10 }
 0x391   : > { %1992 = vmatmul.mubr.msk.f32.vlgmr.msra.gmra.mrb[12].mxu1 %vm475_vm2, %v1070_v19  ;;  %1688 = vst.msk [vmem:[%s2414_s23 + $0x18] sm:$0xff] %vm475_vm2, %v1070_v19  ;;  %s2100_s23 = scalar_lea.vmem %s2099_s16, 1024 }
 0x392   : > { %2001 = vmatprep.mubr.msk.f32.mxu1 %vm2207_vm1, %v2206_v10  ;;  %2000 = vmatpush3.msra.mxu1 %v1375_v20  ;;  %p2102_p2 = scmp.lt.s32.totalorder %s2100_s23, %s2094_s12 }
 0x393   : > { %2009 = vmatprep.subr.mxu1 %v2206_v10 }
 0x394   : > { %p2103_p3 = por %p2102_p2, %p2101_p1 }
 0x396   : > { %p2104_p5 = pnand %p2103_p3, %p2097_p0 }
 0x458   : > { %v1143_v23 = vpop.f32.mrb[10].mxu0 }
 0x459   : > { %v1978_v24 = vpop.f32.mrb[11].mxu0  ;;  %2002 = vmatmul.mubr.msk.f32.vlgmr.msra.gmra.mrb[14].mxu1 %vm475_vm2, %v1143_v23 }
 0x45a   : > { %2010 = vmatpush3.msra.mxu1 %v1883_v22  ;;  %2011 = vmatprep.mubr.msk.f32.mxu1 %vm2207_vm1, %v2206_v10 }
 0x45c   : > { %v1219_v26 = vpop.f32.mrb[10].mxu1 }
 0x45d   : > { %v1983_v27 = vpop.f32.mrb[11].mxu1  ;;  %1997 = vmatmul.mubr.msk.f32.vlgmr.msra.gmra.mrb[14].mxu0 %vm475_vm2, %v1219_v26 }
 0x45e   : > { %2005 = vmatpush3.msra.mxu0 %v1881_v25  ;;  %2006 = vmatprep.mubr.msk.f32.mxu0 %vm2207_vm1, %v2206_v10 }
 0x460   : > { %v1295_v28 = vpop.f32.mrb[12].mxu0 }
 0x461   : > { %v1988_v29 = vpop.f32.mrb[13].mxu0  ;;  %2007 = vmatmul.mubr.msk.f32.vlgmr.msra.gmra.mrb[16].mxu0 %vm475_vm2, %v1295_v28 }
 0x464   : > { %v1371_v30 = vpop.f32.mrb[12].mxu1 }
 0x465   : > { %v1993_v31 = vpop.f32.mrb[13].mxu1  ;;  %2012 = vmatmul.mubr.msk.f32.vlgmr.msra.gmra.mrb[16].mxu1 %vm475_vm2, %v1371_v30 }
 0x466   : > { %2107 = shalt.err (!%p2104_p5)
}
 0x467   : > { %s2108_s17 = scalar_lea.hbm %s2468_s8, 512  ;;  %s2112_s22 = scalar_lea.hbm %s2558_s7, 1024 }
 0x468   : > { %p2109_p6 = scmp.ne.s32.totalorder %s2468_s8, %s2108_s17  ;;  %p2113_p10 = scmp.lt.u32.totalorder %s2468_s8, %s2558_s7 }
 0x469   : > { %p2114_p11 = scmp.lt.u32.totalorder %s2112_s22, %s2108_s17  ;;  %p2116_p13 = scmp.lt.u32.totalorder %s2108_s17, %s2468_s8 }
 0x46a   : > { %p2110_p7 = pnand %p2109_p6, %p2292_p4 }
 0x46b   : > { %p2115_p12 = por %p2114_p11, %p2113_p10 }
 0x46c   : > { %p2111_p9 = pneg %p2110_p7 }
 0x46d   : > { %p2117_p0 = por %p2116_p13, %p2115_p12 }
 0x46f   : > { %p2118_p1 = pnand %p2117_p0, %p2111_p9 }
 0x471   : > { %2121 = shalt.err (!%p2118_p1)
}
 0x472   : > { %s2209_s12 = smov 128   ;;  %s2210_s16 = smov 8   ;;  %v1885_v40 = vld [vmem:[%s2556_s5] ss:$0 sm:$0xff] }
 0x473   : > { %2015 = dma.vmem_to_hbm [thread:$0]  (%p2292_p4), %s2463_s19, 512, %s2468_s8, %s1695_s10, %s2209_s12, %s2209_s12, %s2210_s16  }
 0x474   : > { %s1848_s23 = sshll.u32 %s2410_s21, 3  ;;  %s1888_s20 = sshll.u32 %s2196_s27, 7 }
 0x475   : > { %s310_s22 = scalar_lea.vmem [#allocation3], %s1848_s23  ;;  %s2502_s10 = scalar_lea.hbm %s2557_s6, %s1888_s20 }
 0x476   : > { %s1709_s30 = sshll.u32 %s310_s22, 4  ;;  %s1690_s15 = scalar_lea.sflag [#allocation4], %s2410_s21  ;;  %s2504_s30 = int_to_ptr.vmem [resolvable:$true] %s1709_s30 }
 0x477   : > { %s2122_s12 = scalar_lea.vmem %s2504_s30, 128  ;;  %s2211_s27 = smov [#allocation3]  }
 0x478   : > { %p2123_p2 = scmp.ne.s32.totalorder %s2504_s30, %s2122_s12  ;;  %s2126_s16 = sshll.u32 %s2211_s27, 4  ;;  %s2127_s16 = int_to_ptr.vmem [resolvable:$false] %s2126_s16 }
 0x479   : > { %s2128_s23 = scalar_lea.vmem %s2127_s16, 256  ;;  %p2129_p6 = scmp.lt.s32.totalorder %s2504_s30, %s2127_s16 }
 0x47a   : > { %p2124_p3 = pnand %p2123_p2, %p2292_p4  ;;  %p2130_p7 = scmp.lt.s32.totalorder %s2128_s23, %s2122_s12 }
 0x47c   : > { %p2125_p5 = pneg %p2124_p3  ;;  %p2131_p9 = por %p2130_p7, %p2129_p6 }
 0x47e   : > { %p2132_p10 = pnand %p2131_p9, %p2125_p5 }
 0x52c   : > { %v1520_v10 = vpop.f32.mrb[14].mxu1 }
 0x52d   : > { %v2003_v32 = vpop.f32.mrb[15].mxu1 }
 0x530   : > { %v1447_v33 = vpop.f32.mrb[14].mxu0 }
 0x531   : > { %v1521_v34 = vadd.f32 %v1520_v10, %v1447_v33  ;;  %v1998_v35 = vpop.f32.mrb[15].mxu0 }
 0x534   : > { %v1595_v36 = vpop.f32.mrb[16].mxu0 }
 0x535   : > { %v1599_v37 = vadd.f32 %v1595_v36, %v1521_v34  ;;  %v2008_v38 = vpop.f32.mrb[17].mxu0 }
 0x538   : > { %v1671_v39 = vpop.f32.mrb[16].mxu1 }
 0x539   : > { %v1675_v41 = vadd.f32 %v1671_v39, %v1599_v37  ;;  %v2013_v42 = vpop.f32.mrb[17].mxu1 }
 0x53b   : > { %v1683_v43 = vadd.f32 %v1885_v40, %v1675_v41 }
 0x53d   : > { %1684 = vst.msk [vmem:[%s310_s22] sm:$0xff] %vm342_vm0, %v1683_v43 }
 0x53e   : > { %2135 = shalt.err (!%p2132_p10)
}
 0x53f   : > { %s2136_s21 = scalar_lea.hbm %s2502_s10, 128  ;;  %s2140_s20 = scalar_lea.hbm %s2557_s6, 256 }
 0x540   : > { %p2137_p11 = scmp.ne.s32.totalorder %s2502_s10, %s2136_s21  ;;  %p2141_p0 = scmp.lt.u32.totalorder %s2502_s10, %s2557_s6 }
 0x541   : > { %p2142_p1 = scmp.lt.u32.totalorder %s2140_s20, %s2136_s21  ;;  %p2144_p3 = scmp.lt.u32.totalorder %s2136_s21, %s2502_s10 }
 0x542   : > { %p2138_p12 = pnand %p2137_p11, %p2292_p4 }
 0x543   : > { %p2143_p2 = por %p2142_p1, %p2141_p0 }
 0x544   : > { %p2139_p13 = pneg %p2138_p12 }
 0x545   : > { %p2145_p5 = por %p2144_p3, %p2143_p2 }
 0x547   : > { %p2146_p6 = pnand %p2145_p5, %p2139_p13 }
 0x549   : > { %2149 = shalt.err (!%p2146_p6)
}
 0x54a   : > { %2014 = dma.vmem_to_hbm [thread:$0]  (%p2292_p4), %s2504_s30, 128, %s2502_s10, %s1690_s15  }
 0x54b PF: > { %p2025_p7 = scmp.ge.s32.totalorder %s2204_s29, 2  ;;  %s1738_s8 = sand.u32 1, %s2184_s24  }
 0x54c   : > { %s1739_s12 = scalar_lea.sflag [#allocation4], %s1738_s8 }
 0x54d   : > { %p2019_p9 = pnand %p2025_p7, %p2299_p8 }
 0x54f   : > { %2175 = dma.done.wait (!%p2019_p9), %s1739_s12, 128  }
 0x550   : > { %2177 = vsyncadd (!%p2019_p9), %s1739_s12, 4294967168  ;;  %s1748_s27 = scalar_lea.sflag [#allocation6], %s1738_s8 }
 0x551   : > { %2179 = dma.done.wait (!%p2019_p9), %s1748_s27, 512  }
 0x552   : > { %2181 = vsyncadd (!%p2019_p9), %s1748_s27, 4294966784  ;;  %s24_s29 = sadd.s32 1, %s2204_s29   ;;  %s2561_s24 = smov %s2188_s25 }
 0x553   : > { %p21_p10 = scmp.ge.s32.totalorder %s24_s29, 4   ;;  %s2562_s25 = smov %s2192_s26 }
 0x554   : > { %s2563_s26 = smov %s2305_s14  ;;  %s2564_s27 = smov %s2200_s28 }
 0x555   : > { %s2565_s28 = smov %s2567_s9  ;;  %23 = sbr.rel (!%p21_p10) target bundleno = 6 (0x6), region = 114 }
 0x55c   :  { %1753 = vsyncpa [#allocation4], 1 }
 0x55d   :  { %1755 = vsyncpa [#allocation4 + $0x1], 1 }
 0x55e   :  { %1756 = vsyncpa [#allocation6], 1 }
 0x55f   :  { %1758 = vsyncpa [#allocation6 + $0x1], 1 }

</bundles_post_ra>
